<compile_context>
chip_gen: v7x
topology: tpu7x:2x2x1
jax: 0.10.0
libtpu: 0.0.40
codegen_flags: <defaults>
</compile_context>

<pallas_src>
import functools

import jax
import jax.numpy as jnp
from jax.experimental import pallas as pl
from jax.experimental.pallas import tpu as pltpu

_SUBLANE = 8                 # sublane granularity (second-to-last dim, f32)
_VMEM_BUDGET = 12 << 20      # per-step working set cap (< v5e ~16 MiB scoped default)


def _round_up(n, m):
    return (n + m - 1) // m * m


def _pick_block(batch, d_in, d_hid, d_out, x_bytes, w_bytes, block_b):
    """Batch tile: multiple of 8, capped by the batch and a VMEM budget.

    Per-step footprint ~= 2*blk*d_in*x_bytes   (x, double-buffered)
                        + 2*blk*d_out*4        (f32 out, double-buffered)
                        + blk*d_hid*6          (f32 h + compute-dtype copy)
                        + resident weights/biases.
    No forced grid splitting: on single-TC v5e/v6e extra steps are pure
    per-step overhead; on v7x large batches split into multiple steps anyway
    and the 'parallel' batch axis shards across the two TensorCores.
    """
    per_row = 2 * d_in * x_bytes + 2 * d_out * 4 + d_hid * 6
    weight_bytes = (d_in * d_hid + d_hid * d_out) * w_bytes + (d_hid + d_out) * 4
    cap = max(_SUBLANE,
              (_VMEM_BUDGET - 2 * weight_bytes) // per_row // _SUBLANE * _SUBLANE)
    return min(_round_up(batch, _SUBLANE), _round_up(block_b, _SUBLANE), cap)


def _projector_kernel(x_ref, w1_ref, b1_ref, w2_ref, b2_ref, o_ref):
    """Fused MLP tile: ReLU(x @ W1 + b1) @ W2 + b2, f32 MXU accumulation."""
    # In-kernel cast of the x tile to the weight (compute) dtype — x stays in
    # its native dtype in HBM, saving the wrapper-side convert pass.
    x = x_ref[...].astype(w1_ref.dtype)
    h = jnp.dot(x, w1_ref[...], preferred_element_type=jnp.float32)
    h = jnp.maximum(h + b1_ref[...], 0.0)                       # b1: (1, d_hid) f32
    # Post-ReLU activation downcast to the weight dtype so the second matmul
    # also runs at bf16 MXU rate; accumulation stays f32.
    y = jnp.dot(h.astype(w2_ref.dtype), w2_ref[...],
                preferred_element_type=jnp.float32)
    o_ref[...] = (y + b2_ref[...]).astype(o_ref.dtype)          # exact-width store


def prepare_projector_params(w1, b1, w2, b2, compute_dtype=jnp.bfloat16):
    """One-time parameter preprocessing (keep OUT of the per-call path).

    Weights are (in_features, out_features); biases become (1, out_features)
    f32.  Pass compute_dtype=jnp.float32 for exact f32 fidelity (the default
    bf16 storage gives ~1e-2 relative error; accumulation is always f32).
    """
    return (jnp.asarray(w1, compute_dtype),
            jnp.asarray(b1, jnp.float32).reshape(1, -1),
            jnp.asarray(w2, compute_dtype),
            jnp.asarray(b2, jnp.float32).reshape(1, -1))


@functools.partial(jax.jit, static_argnames=("block_b",))
def projector_forward(x, w1, b1, w2, b2, *, block_b=2048):
    """x: (B, d_in).  w1: (d_in, d_hid), b1: (1, d_hid), w2: (d_hid, d_out),
    b2: (1, d_out) — as produced by prepare_projector_params.
    Returns (B, d_out) float32."""
    B, d_in = x.shape
    d_hid = w1.shape[1]
    d_out = w2.shape[1]

    blk = _pick_block(B, d_in, d_hid, d_out,
                      x.dtype.itemsize, w1.dtype.itemsize, block_b)
    grid_b = pl.cdiv(B, blk)
    B_p = grid_b * blk

    # Batch padding only when the tile does not divide B (rows are independent;
    # padded rows are sliced off).  Feature dims are NOT padded: every block
    # spans the full feature axis, so the (8,128) rule is satisfied by
    # "block dim == full array dim" and the f32 output HBM stream stays minimal.
    x_p = x if B_p == B else jnp.pad(x, ((0, B_p - B), (0, 0)))

    flops = 2 * B_p * (d_in * d_hid + d_hid * d_out)
    bytes_accessed = (x_p.size * x_p.dtype.itemsize
                      + B_p * d_out * 4
                      + w1.size * w1.dtype.itemsize + w2.size * w2.dtype.itemsize
                      + b1.size * 4 + b2.size * 4)

    # Per-step VMEM (blk=2048, d_in=128, d_hid=d_out=64): ~3.8 MiB, comfortably
    # under every generation's scoped default, so no vmem_limit_bytes override.
    # TODO(synk): single-buffer the constant-index W/b specs with
    # pipeline_mode=pl.Buffered(1) once validated on the target jax version;
    # at these dims the duplicated copies cost only ~32 KiB of VMEM.
    out = pl.pallas_call(
        _projector_kernel,
        out_shape=jax.ShapeDtypeStruct((B_p, d_out), jnp.float32),
        grid_spec=pltpu.PrefetchScalarGridSpec(
            num_scalar_prefetch=0,
            grid=(grid_b,),
            in_specs=[
                pl.BlockSpec((blk, d_in), lambda i: (i, 0)),      # x tile
                pl.BlockSpec((d_in, d_hid), lambda i: (0, 0)),    # W1 (resident)
                pl.BlockSpec((1, d_hid), lambda i: (0, 0)),       # b1
                pl.BlockSpec((d_hid, d_out), lambda i: (0, 0)),   # W2 (resident)
                pl.BlockSpec((1, d_out), lambda i: (0, 0)),       # b2
            ],
            out_specs=pl.BlockSpec((blk, d_out), lambda i: (i, 0)),
        ),
        compiler_params=pltpu.CompilerParams(
            dimension_semantics=("parallel",),   # batch axis; shards on v7x TCs
        ),
        cost_estimate=pl.CostEstimate(
            flops=flops, transcendentals=0, bytes_accessed=bytes_accessed),
    )(x_p, w1, b1, w2, b2)

    return out if B_p == B else out[:B]


def init_projector_params(key, input_dim=128, output_dim=64):
    """Deterministic f32 init matching the PyTorch module's shapes.

    PyTorch nn.Linear stores weight as (out, in); we store the transpose
    (in, out) so the kernel computes x @ W + b directly.
    """
    k1, k2, k3, k4 = jax.random.split(key, 4)
    s1 = 1.0 / (input_dim ** 0.5)
    s2 = 1.0 / (output_dim ** 0.5)
    w1 = jax.random.uniform(k1, (input_dim, output_dim), jnp.float32, -s1, s1)
    b1 = jax.random.uniform(k2, (output_dim,), jnp.float32, -s1, s1)
    w2 = jax.random.uniform(k3, (output_dim, output_dim), jnp.float32, -s2, s2)
    b2 = jax.random.uniform(k4, (output_dim,), jnp.float32, -s2, s2)
    return w1, b1, w2, b2


if __name__ == "__main__":
    key = jax.random.PRNGKey(0)
    k_x, k_p = jax.random.split(key)

    batch, input_dim, output_dim = 8, 128, 64
    x = jax.random.normal(k_x, (batch, input_dim), dtype=jnp.float32)
    w1, b1, w2, b2 = init_projector_params(k_p, input_dim, output_dim)

    params = prepare_projector_params(w1, b1, w2, b2)   # one-time bf16 prep
    out = projector_forward(x, *params)
    out = jax.block_until_ready(out)

    # Plain-JAX f32 reference (same semantics as the PyTorch module).  Tolerance
    # covers the intentional bf16 storage of W1/W2/activations (f32 accumulation).
    ref = jnp.maximum(x @ w1 + b1, 0.0) @ w2 + b2
    assert out.shape == (batch, output_dim)
    max_err = float(jnp.max(jnp.abs(out - ref)))
    assert jnp.allclose(out, ref, atol=3e-2, rtol=3e-2), max_err

    print("KERNEL_OK")
</pallas_src>

<mosaic_0001>
module attributes {stable_mosaic.version = 11 : i64} {
  func.func @_projector_kernel(%arg0: i32, %arg1: memref<8x128xf32, #tpu.memory_space<vmem>>, %arg2: memref<128x64xbf16, #tpu.memory_space<vmem>>, %arg3: memref<1x64xf32, #tpu.memory_space<vmem>>, %arg4: memref<64x64xbf16, #tpu.memory_space<vmem>>, %arg5: memref<1x64xf32, #tpu.memory_space<vmem>>, %arg6: memref<8x64xf32, #tpu.memory_space<vmem>>) attributes {dimension_semantics = [#tpu.dimension_semantics<parallel>], iteration_bounds = array<i64: 1>, scalar_prefetch = 0 : i64, scratch_operands = 0 : i64, tpu.core_type = #tpu.core_type<tc>, window_params = [{transform_indices = @transform_0, window_bounds = array<i64: 8, 128>}, {pipeline_mode = #tpu.pipeline_mode<synchronous>, transform_indices = @transform_1, window_bounds = array<i64: 128, 64>}, {pipeline_mode = #tpu.pipeline_mode<synchronous>, transform_indices = @transform_2, window_bounds = array<i64: 1, 64>}, {pipeline_mode = #tpu.pipeline_mode<synchronous>, transform_indices = @transform_3, window_bounds = array<i64: 64, 64>}, {pipeline_mode = #tpu.pipeline_mode<synchronous>, transform_indices = @transform_4, window_bounds = array<i64: 1, 64>}, {transform_indices = @transform_5, window_bounds = array<i64: 8, 64>}]} {
    %c0 = arith.constant 0 : index
    %c0_0 = arith.constant 0 : index
    %0 = vector.load %arg1[%c0, %c0_0] : memref<8x128xf32, #tpu.memory_space<vmem>>, vector<8x128xf32>
    %1 = arith.truncf %0 : vector<8x128xf32> to vector<8x128xbf16>
    %c0_1 = arith.constant 0 : index
    %c0_2 = arith.constant 0 : index
    %2 = vector.load %arg2[%c0_1, %c0_2] : memref<128x64xbf16, #tpu.memory_space<vmem>>, vector<128x64xbf16>
    %cst = arith.constant dense<0.000000e+00> : vector<8x64xf32>
    %3 = tpu.matmul %1, %2, %cst {dimension_numbers = #tpu.dot_dimension_numbers<[1], [0], [0], [1], [0, 0, 1, 1], [], []>} : vector<8x128xbf16>, vector<128x64xbf16>, vector<8x64xf32> -> vector<8x64xf32>
    %c0_3 = arith.constant 0 : index
    %c0_4 = arith.constant 0 : index
    %4 = vector.load %arg3[%c0_3, %c0_4] : memref<1x64xf32, #tpu.memory_space<vmem>>, vector<1x64xf32>
    %5 = vector.broadcast %4 : vector<1x64xf32> to vector<8x64xf32>
    %6 = arith.addf %3, %5 : vector<8x64xf32>
    %cst_5 = arith.constant 0.000000e+00 : f32
    %7 = vector.broadcast %cst_5 : f32 to vector<8x64xf32>
    %8 = arith.maximumf %6, %7 : vector<8x64xf32>
    %9 = arith.truncf %8 : vector<8x64xf32> to vector<8x64xbf16>
    %c0_6 = arith.constant 0 : index
    %c0_7 = arith.constant 0 : index
    %10 = vector.load %arg4[%c0_6, %c0_7] : memref<64x64xbf16, #tpu.memory_space<vmem>>, vector<64x64xbf16>
    %cst_8 = arith.constant dense<0.000000e+00> : vector<8x64xf32>
    %11 = tpu.matmul %9, %10, %cst_8 {dimension_numbers = #tpu.dot_dimension_numbers<[1], [0], [0], [1], [0, 0, 1, 1], [], []>} : vector<8x64xbf16>, vector<64x64xbf16>, vector<8x64xf32> -> vector<8x64xf32>
    %c0_9 = arith.constant 0 : index
    %c0_10 = arith.constant 0 : index
    %12 = vector.load %arg5[%c0_9, %c0_10] : memref<1x64xf32, #tpu.memory_space<vmem>>, vector<1x64xf32>
    %13 = vector.broadcast %12 : vector<1x64xf32> to vector<8x64xf32>
    %14 = arith.addf %11, %13 : vector<8x64xf32>
    %c0_11 = arith.constant 0 : index
    %c0_12 = arith.constant 0 : index
    %15 = vector.load %arg6[%c0_11, %c0_12] : memref<8x64xf32, #tpu.memory_space<vmem>>, vector<8x64xf32>
    tpu.vector_store %arg6[%c0_11, %c0_12], %14 {strides = array<i32>} : memref<8x64xf32, #tpu.memory_space<vmem>>, vector<8x64xf32>,
    return
  }
  func.func @transform_0(%arg0: i32) -> (i32, i32) {
    %c0_i32 = arith.constant 0 : i32
    %c0_i32_0 = arith.constant 0 : i32
    return %arg0, %c0_i32 : i32, i32
  }
  func.func @transform_1(%arg0: i32) -> (i32, i32) {
    %c0_i32 = arith.constant 0 : i32
    %c0_i32_0 = arith.constant 0 : i32
    %c0_i32_1 = arith.constant 0 : i32
    return %c0_i32, %c0_i32_0 : i32, i32
  }
  func.func @transform_2(%arg0: i32) -> (i32, i32) {
    %c0_i32 = arith.constant 0 : i32
    %c0_i32_0 = arith.constant 0 : i32
    %c0_i32_1 = arith.constant 0 : i32
    return %c0_i32, %c0_i32_0 : i32, i32
  }
  func.func @transform_3(%arg0: i32) -> (i32, i32) {
    %c0_i32 = arith.constant 0 : i32
    %c0_i32_0 = arith.constant 0 : i32
    %c0_i32_1 = arith.constant 0 : i32
    return %c0_i32, %c0_i32_0 : i32, i32
  }
  func.func @transform_4(%arg0: i32) -> (i32, i32) {
    %c0_i32 = arith.constant 0 : i32
    %c0_i32_0 = arith.constant 0 : i32
    %c0_i32_1 = arith.constant 0 : i32
    return %c0_i32, %c0_i32_0 : i32, i32
  }
  func.func @transform_5(%arg0: i32) -> (i32, i32) {
    %c0_i32 = arith.constant 0 : i32
    %c0_i32_0 = arith.constant 0 : i32
    return %arg0, %c0_i32 : i32, i32
  }
}

</mosaic_0001>

<bundles_post_ra>
// kernel: projector_forward.1
= control target key start
LH: loop header
LB: loop body
LE: loop exit
PB: predicated region body
PF: predicated region fallthrough
CT: control target
= control target key end

     0   :  { %v335_v1 = vmov 0.0   ;;  %vm336_vm0 = vmmov 0   ;;  %s425_s0 = inlined_call_operand.vmem [shape: f32[8,128], index: 0, kind: input, shape index: {}]   ;;  %s426_s1 = inlined_call_operand.vmem [shape: bf16[128,64], index: 1, kind: input, shape index: {}]   ;;  %s427_s2 = inlined_call_operand.vmem [shape: f32[1,64], index: 2, kind: input, shape index: {}]   ;;  %s428_s3 = inlined_call_operand.vmem [shape: bf16[64,64], index: 3, kind: input, shape index: {}]   ;;  %s429_s4 = inlined_call_operand.vmem [shape: f32[1,64], index: 4, kind: input, shape index: {}]   ;;  %s430_s5 = inlined_call_operand.hbm [shape: f32[8,64], index: 5, kind: output, shape index: {}]  }
   0x1   :  { %v299_v0 = vld [vmem:[%s426_s1] sm:$0xff]   ;;  %264 = vmatprep.subr.bf16.mxu0 %v335_v1  ;;  %284 = vmatprep.subr.bf16.mxu1 %v335_v1  ;;  %v300_v2 = vld [vmem:[%s426_s1 + $0x8] sm:$0xff]   ;;  %v301_v3 = vld [vmem:[%s426_s1 + $0x10] sm:$0xff]  }
   0x2   :  { %265 = vmatpush3.bf16.msra.mxu0 %v299_v0  ;;  %280 = vmatprep.mubr.msk.bf16.mxu0 %vm336_vm0, %v335_v1  ;;  %v307_v4 = vld [vmem:[%s428_s3] sm:$0xff]   ;;  %v302_v5 = vld [vmem:[%s426_s1 + $0x18] sm:$0xff]   ;;  %v308_v6 = vld [vmem:[%s428_s3 + $0x8] sm:$0xff]  }
   0x3   :  { %266 = vmatprep.subr.bf16.mxu0 %v335_v1  ;;  %292 = vmatprep.mubr.msk.bf16.mxu1 %vm336_vm0, %v335_v1 }
   0x4   :  { %285 = vmatpush3.bf16.msra.mxu1 %v307_v4 }
   0x5   :  { %286 = vmatprep.subr.bf16.mxu1 %v335_v1 }
   0x6   :  { %267 = vmatpush3.bf16.msra.mxu0 %v300_v2 }
   0x7   :  { %268 = vmatprep.subr.bf16.mxu0 %v335_v1 }
   0xa   :  { %269 = vmatpush3.bf16.msra.mxu0 %v301_v3 }
   0xb   :  { %270 = vmatprep.subr.bf16.mxu0 %v335_v1 }
   0xc   :  { %10 = vsyncpa [#allocation3], 0  ;;  %v303_v7 = vld [vmem:[%s426_s1 + $0x20] sm:$0xff]   ;;  %287 = vmatpush3.bf16.msra.mxu1 %v308_v6  ;;  %v304_v8 = vld [vmem:[%s426_s1 + $0x28] sm:$0xff]   ;;  %vm176_vm1 = vcmask 523264   ;;  %s337_s21 = smov [#allocation2]  }
   0xd   :  { %288 = vmatprep.subr.bf16.mxu1 %v335_v1  ;;  %v305_v9 = vld [vmem:[%s426_s1 + $0x30] sm:$0xff]   ;;  %v306_v10 = vld [vmem:[%s426_s1 + $0x38] sm:$0xff]   ;;  %v22_v11 = vld [vmem:[%s425_s0] sm:$0xff] }
   0xe   :  { %271 = vmatpush3.bf16.msra.mxu0 %v302_v5  ;;  %v23_v12 = vpack.c.bf16 %v22_v11, %v22_v11  ;;  %v309_v13 = vld [vmem:[%s428_s3 + $0x10] sm:$0xff]   ;;  %v310_v14 = vld [vmem:[%s428_s3 + $0x18] sm:$0xff]   ;;  %v235_v15 = vld [vmem:[%s427_s2] ss:$0 sm:$0xff]  ;;  %s227_s3 = sshll.u32 %s337_s21, 4  ;;  %s228_s3 = int_to_ptr.vmem [resolvable:$true] %s227_s3 }
   0xf   :  { %272 = vmatprep.subr.bf16.mxu0 %v335_v1  ;;  %v244_v23 = vld [vmem:[%s429_s4] ss:$0 sm:$0xff]  ;;  %s311_s2 = scalar_lea.vmem %s228_s3, 128  ;;  %p316_p1 = scmp.lt.s32.totalorder %s228_s3, %s228_s3 }
  0x10   :  { %289 = vmatpush3.bf16.msra.mxu1 %v309_v13  ;;  %p312_p0 = scmp.ne.s32.totalorder %s228_s3, %s311_s2  ;;  %p317_p2 = scmp.lt.s32.totalorder %s311_s2, %s311_s2 }
  0x11   :  { %290 = vmatprep.subr.bf16.mxu1 %v335_v1 }
  0x12   :  { %273 = vmatpush3.bf16.msra.mxu0 %v303_v7  ;;  %p318_p3 = por %p317_p2, %p316_p1 }
  0x13   :  { %274 = vmatprep.subr.bf16.mxu0 %v335_v1 }
  0x14   :  { %291 = vmatpush3.bf16.msra.mxu1 %v310_v14  ;;  %p319_p4 = pnand %p318_p3, %p312_p0 }
  0x16   :  { %275 = vmatpush3.bf16.msra.mxu0 %v304_v8 }
  0x17   :  { %276 = vmatprep.subr.bf16.mxu0 %v335_v1 }
  0x1a   :  { %277 = vmatpush3.bf16.msra.mxu0 %v305_v9 }
  0x1b   :  { %278 = vmatprep.subr.bf16.mxu0 %v335_v1 }
  0x1e   :  { %279 = vmatpush3.bf16.msra.mxu0 %v306_v10 }
  0x21   :  { %281 = vmatmul.mubr.bf16.vlgmr.msra.gmra.mrb[0].mxu0 %v23_v12 }
  0xf4   :  { %v129_v16 = vpop.f32.mrb[0].mxu0 }
  0xf5   :  { %v130_v17 = vadd.f32 %v235_v15, %v129_v16  ;;  %v282_v18 = vpop.f32.mrb[1].mxu0 }
  0xf6   :  { %v132_v19 = vpop.f32.mrb[2].mxu0 }
  0xf7   :  { %v135_v20 = vmax.f32 %v130_v17, 0.0  ;;  %v283_v21 = vpop.f32.mrb[3].mxu0 }
  0xf9   :  { %v136_v22 = vpack.c.bf16 %v135_v20, %v135_v20 }
  0xfb   :  { %293 = vmatmul.mubr.msk.bf16.vlgmr.msra.gmra.mrb[0].mxu1 %vm176_vm1, %v136_v22 }
 0x1ce   :  { %v214_v24 = vpop.f32.mrb[0].mxu1 }
 0x1cf   :  { %v215_v25 = vadd.f32 %v244_v23, %v214_v24  ;;  %v294_v26 = vpop.f32.mrb[1].mxu1 }
 0x1d0   :  { %v217_v27 = vpop.f32.mrb[2].mxu1 }
 0x1d1   :  { %220 = vst.msk [vmem:[#allocation2] sm:$0xff] %vm176_vm1, %v215_v25  ;;  %v295_v28 = vpop.f32.mrb[3].mxu1 }
 0x1d2   :  { %322 = shalt.err (!%p319_p4)
}
 0x1d3   :  { %s323_s4 = scalar_lea.hbm %s430_s5, 128 }
 0x1d4   :  { %p324_p5 = scmp.ne.s32.totalorder %s430_s5, %s323_s4  ;;  %p327_p6 = scmp.lt.u32.totalorder %s323_s4, %s430_s5 }
 0x1d6   :  { %p329_p7 = pnand %p327_p6, %p324_p5 }
 0x1d8   :  { %332 = shalt.err (!%p329_p7)
}
 0x1d9   :  { %230 = dma.vmem_to_hbm [thread:$0]  %s228_s3, 128, %s430_s5, [#allocation3]  }
 0x1da   :  { %333 = dma.done.wait [#allocation3], 128  }
 0x1db   :  { %334 = vsyncadd [#allocation3], 4294967168 }
 0x1dc   :  { %234 = vsyncpa [#allocation3], 1 }

</bundles_post_ra>
